<compile_context>
chip_gen: v5e
topology: v5e:2x2
jax: 0.10.0
libtpu: 0.0.40
codegen_flags: <defaults>
</compile_context>

<pallas_src>
import functools

import jax
import jax.numpy as jnp
from jax import lax
from jax.experimental import pallas as pl
from jax.experimental.pallas import tpu as pltpu


def _round_up(x, m):
    return ((x + m - 1) // m) * m


def _pad_axis0(x, target):
    pad = target - x.shape[0]
    if pad <= 0:
        return x
    widths = [(0, pad)] + [(0, 0)] * (x.ndim - 1)
    return jnp.pad(x, widths)


def _pick_tile_n(n, mp):
    """TILE_N such that the (TILE_N, Mp) f32 working set (double-buffered
    output + sim/s/scores temporaries, ~6 live copies) stays under ~24 MiB.
    Sized for v7x (64 MiB physical VMEM); also safe on v5e/v6e (128 MiB)."""
    budget = 24 * 1024 * 1024
    t = budget // (6 * 4 * mp)
    t = max(8, min(512, (t // 8) * 8))
    t = min(t, _round_up(n, 8))
    return int(t)


def _col_sum_kernel(ref_ref, src_ref, rmask_ref, smask_ref, colsum_ref):
    """Pass 1 (only for dual_normalization on multi-tile grids).

    Accumulates the (1, Mp) column sum of s = exp(2*<ref,src>) * masks across
    all N tiles into a resident output block (grid axis is "arbitrary").
    """
    @pl.when(pl.program_id(0) == 0)
    def _():
        colsum_ref[...] = jnp.zeros_like(colsum_ref)

    # ref_ref already carries the folded 2x; bf16 operands, f32 MXU accumulate.
    sim = jnp.dot(ref_ref[...], src_ref[...],
                  preferred_element_type=jnp.float32)          # (TILE_N, Mp)
    s = jnp.exp(sim) * rmask_ref[...] * smask_ref[...]
    colsum_ref[...] += jnp.sum(s, axis=0, keepdims=True)


def _scores_kernel(dual_normalization, use_n2p, external_colsum, *refs):
    """Pass 2: matching scores for one N tile.

    Refs (in order):
      ref_ref    : (TILE_N, C)  bf16, features pre-scaled by 2
      src_ref    : (C, Mp)      bf16, pre-transposed source features
      rmask_ref  : (TILE_N, 1)  f32 validity mask (0 for masked / padded rows)
      smask_ref  : (1, Mp)      f32 validity mask
      [colsum_ref: (1, Mp)      f32 precomputed column sums]  (external_colsum)
      [rok_ref   : (TILE_N, 1)  f32 n2p overlap 0/1 mask]     (use_n2p)
      [sok_ref   : (1, Mp)      f32 n2p overlap 0/1 mask]     (use_n2p)
      out_ref    : (TILE_N, Mp) f32 matching scores (masked entries exactly 0)
    """
    refs = list(refs)
    out_ref = refs.pop()
    ref_ref = refs.pop(0)
    src_ref = refs.pop(0)
    rmask_ref = refs.pop(0)
    smask_ref = refs.pop(0)
    colsum_ref = refs.pop(0) if (dual_normalization and external_colsum) else None
    rok_ref = refs.pop(0) if use_n2p else None
    sok_ref = refs.pop(0) if use_n2p else None

    sim = jnp.dot(ref_ref[...], src_ref[...],
                  preferred_element_type=jnp.float32)          # (TILE_N, Mp)

    if dual_normalization:
        # exp(-d) = exp(2*sim) * e^-2; the e^-2 constant cancels in the dual
        # normalization, so drop it.  Masks applied BEFORE the sums (matches
        # PyTorch's nonzero compaction for valid entries), as chained
        # broadcast multiplies (no materialized (TILE_N, Mp) valid mask).
        s = jnp.exp(sim) * rmask_ref[...] * smask_ref[...]
        row_sum = jnp.sum(s, axis=1, keepdims=True)            # (TILE_N, 1)
        if external_colsum:
            col_sum = colsum_ref[...]                           # (1, Mp)
        else:
            col_sum = jnp.sum(s, axis=0, keepdims=True)
        # Exact reciprocals (approx=True could flip near-tied top-k ordering).
        row_inv = pl.reciprocal(jnp.where(row_sum == 0.0, 1.0, row_sum))
        col_inv = pl.reciprocal(jnp.where(col_sum == 0.0, 1.0, col_sum))
        scores = (s * row_inv) * (s * col_inv)
    else:
        scores = jnp.exp(sim - 2.0) * rmask_ref[...] * smask_ref[...]

    if use_n2p:
        # PyTorch applies the n2p overlap mask AFTER dual normalization.
        scores = scores * rok_ref[...] * sok_ref[...]

    out_ref[...] = scores


def superpoint_matching(ref_feats, src_feats, num_correspondences,
                        ref_masks=None, src_masks=None,
                        ref_n2p_scores_c=None, src_n2p_scores_c=None,
                        dual_normalization=True, n2p_score_threshold=None,
                        tile_n=None):
    """JAX/Pallas equivalent of SuperPointMatching.forward.

    Returns (ref_corr_indices, src_corr_indices, corr_scores).

    Instead of torch.nonzero compaction (dynamic shape), masked / padded
    rows & columns are zeroed inside the kernel so top-k never selects them;
    returned indices are already in the original coordinate frame.  Equivalent
    whenever num_correspondences <= number of strictly-positive valid pairs.
    """
    N, C = ref_feats.shape
    M, _ = src_feats.shape

    if ref_masks is None:
        ref_masks = jnp.ones((N,), dtype=bool)
    if src_masks is None:
        src_masks = jnp.ones((M,), dtype=bool)

    use_n2p = ref_n2p_scores_c is not None
    if use_n2p and n2p_score_threshold is None:
        raise ValueError('"n2p_scores_c" is given but "n2p_score_threshold" is not set.')

    # Lane-dense output: pad M up to a multiple of 128.
    Mp = _round_up(M, 128)
    TILE_N = int(tile_n) if tile_n is not None else _pick_tile_n(N, Mp)
    TILE_N = max(8, (TILE_N // 8) * 8)
    Np = _round_up(N, TILE_N)
    grid_n = Np // TILE_N

    # Fold the 2x of exp(-(2 - 2*sim)) into the bf16 cast (power of two: exact).
    ref_b = _pad_axis0((ref_feats * 2.0).astype(jnp.bfloat16), Np)       # (Np, C)
    # Pre-transposed src: canonical (TILE_N, C) x (C, Mp) contraction on MXU.
    src_b = _pad_axis0(src_feats.astype(jnp.bfloat16), Mp).T             # (C, Mp)
    rmask = _pad_axis0(ref_masks.astype(jnp.float32), Np).reshape(Np, 1)
    smask = _pad_axis0(src_masks.astype(jnp.float32), Mp).reshape(1, Mp)

    # Explicit VMEM limit sized from the actual working set (v7x-safe).
    vmem_limit = int(min(48 * 1024 * 1024,
                         max(32 * 1024 * 1024,
                             8 * TILE_N * Mp * 4 + 4 * C * Mp * 2 + (2 << 20))))

    base_inputs = [ref_b, src_b, rmask, smask]
    base_in_specs = [
        pl.BlockSpec((TILE_N, C), lambda i: (i, 0)),
        pl.BlockSpec((C, Mp), lambda i: (0, 0)),
        pl.BlockSpec((TILE_N, 1), lambda i: (i, 0)),
        pl.BlockSpec((1, Mp), lambda i: (0, 0)),
    ]

    external_colsum = bool(dual_normalization) and grid_n > 1
    if external_colsum:
        # Pass 1: stream all N tiles once, accumulating the (1, Mp) column sum
        # in a resident output block — only a tiny HBM writeback, and the
        # intermediate s never round-trips HBM.
        col_sum = pl.pallas_call(
            _col_sum_kernel,
            out_shape=jax.ShapeDtypeStruct((1, Mp), jnp.float32),
            grid_spec=pltpu.PrefetchScalarGridSpec(
                num_scalar_prefetch=0,
                grid=(grid_n,),
                in_specs=base_in_specs,
                out_specs=pl.BlockSpec((1, Mp), lambda i: (0, 0)),
            ),
            compiler_params=pltpu.CompilerParams(
                dimension_semantics=("arbitrary",),
                vmem_limit_bytes=vmem_limit),
        )(*base_inputs)

    inputs = list(base_inputs)
    in_specs = list(base_in_specs)
    if external_colsum:
        inputs.append(col_sum)
        in_specs.append(pl.BlockSpec((1, Mp), lambda i: (0, 0)))
    if use_n2p:
        rok = _pad_axis0((ref_n2p_scores_c > n2p_score_threshold)
                         .astype(jnp.float32), Np).reshape(Np, 1)
        sok = _pad_axis0((src_n2p_scores_c > n2p_score_threshold)
                         .astype(jnp.float32), Mp).reshape(1, Mp)
        inputs += [rok, sok]
        in_specs += [pl.BlockSpec((TILE_N, 1), lambda i: (i, 0)),
                     pl.BlockSpec((1, Mp), lambda i: (0, 0))]

    kernel = functools.partial(_scores_kernel, bool(dual_normalization),
                               use_n2p, external_colsum)

    # Pass 2: per-tile scores.  N axis is "parallel" (independent tiles), so it
    # shards across v7x's two TensorCores; harmless on v5e/v6e.
    matching_scores = pl.pallas_call(
        kernel,
        out_shape=jax.ShapeDtypeStruct((Np, Mp), jnp.float32),
        grid_spec=pltpu.PrefetchScalarGridSpec(
            num_scalar_prefetch=0,
            grid=(grid_n,),
            in_specs=in_specs,
            out_specs=pl.BlockSpec((TILE_N, Mp), lambda i: (i, 0)),
        ),
        compiler_params=pltpu.CompilerParams(
            dimension_semantics=("parallel",),
            vmem_limit_bytes=vmem_limit),
    )(*inputs)

    # Flattened top-k on the padded, unsliced matrix (no minor-dim slice, so no
    # relayout copy).  Padded/masked entries are exact zeros and are never
    # selected while num_correspondences <= #strictly-positive valid pairs.
    k = min(int(num_correspondences), N * M)
    corr_scores, corr_indices = lax.top_k(matching_scores.reshape(-1), k)
    ref_corr_indices = corr_indices // Mp
    src_corr_indices = corr_indices % Mp
    return ref_corr_indices, src_corr_indices, corr_scores


def _reference_scores(ref_feats, src_feats, ref_masks, src_masks,
                      ref_n2p=None, src_n2p=None,
                      dual_normalization=True, n2p_threshold=None):
    """Pure-JAX transcription of the PyTorch forward (zero-mask form).

    Uses the same bf16 matmul precision as the kernel so comparisons are tight.
    """
    sim = jnp.dot(ref_feats.astype(jnp.bfloat16),
                  src_feats.astype(jnp.bfloat16).T,
                  preferred_element_type=jnp.float32)
    scores = jnp.exp(-(2.0 - 2.0 * sim))
    valid = (ref_masks.astype(jnp.float32)[:, None]
             * src_masks.astype(jnp.float32)[None, :])
    scores = scores * valid
    if dual_normalization:
        rs = scores.sum(axis=1, keepdims=True)
        cs = scores.sum(axis=0, keepdims=True)
        rs = jnp.where(rs == 0.0, 1.0, rs)
        cs = jnp.where(cs == 0.0, 1.0, cs)
        scores = (scores / rs) * (scores / cs)
    if ref_n2p is not None:
        ok = ((ref_n2p > n2p_threshold)[:, None]
              & (src_n2p > n2p_threshold)[None, :]).astype(jnp.float32)
        scores = scores * ok
    return scores


if __name__ == "__main__":
    key = jax.random.PRNGKey(0)
    k1, k2, k3, k4, k5, k6, k7, k8 = jax.random.split(key, 8)

    # ---- test 1: no masks, dual normalization, single-tile grid -------------
    N, M, C = 32, 48, 32
    num_correspondences = 16

    ref_feats = jax.random.normal(k1, (N, C), dtype=jnp.float32)
    src_feats = jax.random.normal(k2, (M, C), dtype=jnp.float32)
    ref_feats = ref_feats / jnp.linalg.norm(ref_feats, axis=1, keepdims=True)
    src_feats = src_feats / jnp.linalg.norm(src_feats, axis=1, keepdims=True)

    ref_idx, src_idx, scores = superpoint_matching(
        ref_feats, src_feats, num_correspondences, dual_normalization=True)
    jax.block_until_ready((ref_idx, src_idx, scores))

    ref_mat = _reference_scores(
        ref_feats, src_feats,
        jnp.ones((N,), bool), jnp.ones((M,), bool),
        dual_normalization=True)
    sc_ref, _ = lax.top_k(ref_mat.reshape(-1), num_correspondences)
    assert jnp.allclose(scores, sc_ref, rtol=1e-3, atol=1e-8)
    sel = ref_mat[ref_idx, src_idx]
    assert jnp.allclose(jnp.sort(sel), jnp.sort(sc_ref), rtol=1e-3, atol=1e-8)

    # ---- test 2: validity masks + n2p threshold, single-tile grid -----------
    ref_masks = jnp.arange(N) < 28
    src_masks = jnp.arange(M) < 40
    ref_n2p = jax.random.uniform(k3, (N,), dtype=jnp.float32)
    src_n2p = jax.random.uniform(k4, (M,), dtype=jnp.float32)
    thr = 0.3

    ref_idx2, src_idx2, scores2 = superpoint_matching(
        ref_feats, src_feats, num_correspondences,
        ref_masks=ref_masks, src_masks=src_masks,
        ref_n2p_scores_c=ref_n2p, src_n2p_scores_c=src_n2p,
        dual_normalization=True, n2p_score_threshold=thr)
    jax.block_until_ready((ref_idx2, src_idx2, scores2))

    ref_mat2 = _reference_scores(
        ref_feats, src_feats, ref_masks, src_masks,
        ref_n2p=ref_n2p, src_n2p=src_n2p,
        dual_normalization=True, n2p_threshold=thr)
    sc_ref2, _ = lax.top_k(ref_mat2.reshape(-1), num_correspondences)
    assert jnp.allclose(scores2, sc_ref2, rtol=1e-3, atol=1e-8)
    sel2 = ref_mat2[ref_idx2, src_idx2]
    assert jnp.allclose(jnp.sort(sel2), jnp.sort(sc_ref2), rtol=1e-3, atol=1e-8)

    # ---- test 3: multi-tile grid (forced tile_n=8) -> 2-pass col-sum path ----
    N3, M3 = 40, 200
    ref_feats3 = jax.random.normal(k5, (N3, C), dtype=jnp.float32)
    src_feats3 = jax.random.normal(k6, (M3, C), dtype=jnp.float32)
    ref_feats3 = ref_feats3 / jnp.linalg.norm(ref_feats3, axis=1, keepdims=True)
    src_feats3 = src_feats3 / jnp.linalg.norm(src_feats3, axis=1, keepdims=True)
    ref_masks3 = jnp.arange(N3) < 36
    src_masks3 = jnp.arange(M3) < 180
    ref_n2p3 = jax.random.uniform(k7, (N3,), dtype=jnp.float32)
    src_n2p3 = jax.random.uniform(k8, (M3,), dtype=jnp.float32)

    ref_idx3, src_idx3, scores3 = superpoint_matching(
        ref_feats3, src_feats3, num_correspondences,
        ref_masks=ref_masks3, src_masks=src_masks3,
        ref_n2p_scores_c=ref_n2p3, src_n2p_scores_c=src_n2p3,
        dual_normalization=True, n2p_score_threshold=thr, tile_n=8)
    jax.block_until_ready((ref_idx3, src_idx3, scores3))

    ref_mat3 = _reference_scores(
        ref_feats3, src_feats3, ref_masks3, src_masks3,
        ref_n2p=ref_n2p3, src_n2p=src_n2p3,
        dual_normalization=True, n2p_threshold=thr)
    sc_ref3, _ = lax.top_k(ref_mat3.reshape(-1), num_correspondences)
    assert jnp.allclose(scores3, sc_ref3, rtol=1e-3, atol=1e-8)
    sel3 = ref_mat3[ref_idx3, src_idx3]
    assert jnp.allclose(jnp.sort(sel3), jnp.sort(sc_ref3), rtol=1e-3, atol=1e-8)

    print("KERNEL_OK")
</pallas_src>

<mosaic_0001>
module attributes {stable_mosaic.version = 11 : i64} {
  func.func @_scores_kernel(%arg0: i32, %arg1: memref<32x32xbf16, #tpu.memory_space<vmem>>, %arg2: memref<32x128xbf16, #tpu.memory_space<vmem>>, %arg3: memref<32x1xf32, #tpu.memory_space<vmem>>, %arg4: memref<1x128xf32, #tpu.memory_space<vmem>>, %arg5: memref<32x128xf32, #tpu.memory_space<vmem>>) attributes {dimension_semantics = [#tpu.dimension_semantics<parallel>], iteration_bounds = array<i64: 1>, scalar_prefetch = 0 : i64, scratch_operands = 0 : i64, tpu.core_type = #tpu.core_type<tc>, window_params = [{transform_indices = @transform_0, window_bounds = array<i64: 32, 32>}, {pipeline_mode = #tpu.pipeline_mode<synchronous>, transform_indices = @transform_1, window_bounds = array<i64: 32, 128>}, {transform_indices = @transform_2, window_bounds = array<i64: 32, 1>}, {pipeline_mode = #tpu.pipeline_mode<synchronous>, transform_indices = @transform_3, window_bounds = array<i64: 1, 128>}, {transform_indices = @transform_4, window_bounds = array<i64: 32, 128>}]} {
    %c0 = arith.constant 0 : index
    %c0_0 = arith.constant 0 : index
    %0 = vector.load %arg1[%c0, %c0_0] : memref<32x32xbf16, #tpu.memory_space<vmem>>, vector<32x32xbf16>
    %c0_1 = arith.constant 0 : index
    %c0_2 = arith.constant 0 : index
    %1 = vector.load %arg2[%c0_1, %c0_2] : memref<32x128xbf16, #tpu.memory_space<vmem>>, vector<32x128xbf16>
    %cst = arith.constant dense<0.000000e+00> : vector<32x128xf32>
    %2 = tpu.matmul %0, %1, %cst {dimension_numbers = #tpu.dot_dimension_numbers<[1], [0], [0], [1], [0, 0, 1, 1], [], []>} : vector<32x32xbf16>, vector<32x128xbf16>, vector<32x128xf32> -> vector<32x128xf32>
    %3 = math.exp %2 : vector<32x128xf32>
    %c0_3 = arith.constant 0 : index
    %c0_4 = arith.constant 0 : index
    %4 = vector.load %arg3[%c0_3, %c0_4] : memref<32x1xf32, #tpu.memory_space<vmem>>, vector<32x1xf32>
    %5 = vector.broadcast %4 : vector<32x1xf32> to vector<32x128xf32>
    %6 = arith.mulf %3, %5 : vector<32x128xf32>
    %c0_5 = arith.constant 0 : index
    %c0_6 = arith.constant 0 : index
    %7 = vector.load %arg4[%c0_5, %c0_6] : memref<1x128xf32, #tpu.memory_space<vmem>>, vector<1x128xf32>
    %8 = vector.broadcast %7 : vector<1x128xf32> to vector<32x128xf32>
    %9 = arith.mulf %6, %8 : vector<32x128xf32>
    %cst_7 = arith.constant dense<0.000000e+00> : vector<32xf32>
    %10 = vector.multi_reduction <add>, %9, %cst_7 [1] : vector<32x128xf32> to vector<32xf32>
    %11 = vector.shape_cast %10 : vector<32xf32> to vector<32x1xf32>
    %cst_8 = arith.constant dense<0.000000e+00> : vector<128xf32>
    %12 = vector.multi_reduction <add>, %9, %cst_8 [0] : vector<32x128xf32> to vector<128xf32>
    %13 = vector.shape_cast %12 : vector<128xf32> to vector<1x128xf32>
    %cst_9 = arith.constant 0.000000e+00 : f32
    %14 = vector.broadcast %cst_9 : f32 to vector<32x1xf32>
    %15 = arith.cmpf oeq, %11, %14 : vector<32x1xf32>
    %cst_10 = arith.constant 1.000000e+00 : f32
    %16 = vector.broadcast %cst_10 : f32 to vector<32x1xf32>
    %17 = arith.select %15, %16, %11 : vector<32x1xi1>, vector<32x1xf32>
    %18 = tpu.reciprocal %17 : vector<32x1xf32> -> vector<32x1xf32>
    %cst_11 = arith.constant 0.000000e+00 : f32
    %19 = vector.broadcast %cst_11 : f32 to vector<1x128xf32>
    %20 = arith.cmpf oeq, %13, %19 : vector<1x128xf32>
    %cst_12 = arith.constant 1.000000e+00 : f32
    %21 = vector.broadcast %cst_12 : f32 to vector<1x128xf32>
    %22 = arith.select %20, %21, %13 : vector<1x128xi1>, vector<1x128xf32>
    %23 = tpu.reciprocal %22 : vector<1x128xf32> -> vector<1x128xf32>
    %24 = vector.broadcast %18 : vector<32x1xf32> to vector<32x128xf32>
    %25 = arith.mulf %9, %24 : vector<32x128xf32>
    %26 = vector.broadcast %23 : vector<1x128xf32> to vector<32x128xf32>
    %27 = arith.mulf %9, %26 : vector<32x128xf32>
    %28 = arith.mulf %25, %27 : vector<32x128xf32>
    %c0_13 = arith.constant 0 : index
    %c0_14 = arith.constant 0 : index
    %29 = vector.load %arg5[%c0_13, %c0_14] : memref<32x128xf32, #tpu.memory_space<vmem>>, vector<32x128xf32>
    tpu.vector_store %arg5[%c0_13, %c0_14], %28 {strides = array<i32>} : memref<32x128xf32, #tpu.memory_space<vmem>>, vector<32x128xf32>,
    return
  }
  func.func @transform_0(%arg0: i32) -> (i32, i32) {
    %c0_i32 = arith.constant 0 : i32
    %c0_i32_0 = arith.constant 0 : i32
    return %arg0, %c0_i32 : i32, i32
  }
  func.func @transform_1(%arg0: i32) -> (i32, i32) {
    %c0_i32 = arith.constant 0 : i32
    %c0_i32_0 = arith.constant 0 : i32
    %c0_i32_1 = arith.constant 0 : i32
    return %c0_i32, %c0_i32_0 : i32, i32
  }
  func.func @transform_2(%arg0: i32) -> (i32, i32) {
    %c0_i32 = arith.constant 0 : i32
    %c0_i32_0 = arith.constant 0 : i32
    return %arg0, %c0_i32 : i32, i32
  }
  func.func @transform_3(%arg0: i32) -> (i32, i32) {
    %c0_i32 = arith.constant 0 : i32
    %c0_i32_0 = arith.constant 0 : i32
    %c0_i32_1 = arith.constant 0 : i32
    return %c0_i32, %c0_i32_0 : i32, i32
  }
  func.func @transform_4(%arg0: i32) -> (i32, i32) {
    %c0_i32 = arith.constant 0 : i32
    %c0_i32_0 = arith.constant 0 : i32
    return %arg0, %c0_i32 : i32, i32
  }
}

</mosaic_0001>

<bundles_post_ra>
// kernel: tpu_custom_call.1
= control target key start
LH: loop header
LB: loop body
LE: loop exit
PB: predicated region body
PF: predicated region fallthrough
CT: control target
= control target key end

     0   :  { %v325_v1 = vmov 0   ;;  %s434_s0 = inlined_call_operand.vmem [shape: bf16[32,32], index: 0, kind: input, shape index: {}]   ;;  %s435_s1 = inlined_call_operand.vmem [shape: bf16[32,128], index: 1, kind: input, shape index: {}]   ;;  %s436_s2 = inlined_call_operand.vmem [shape: f32[32,1], index: 2, kind: input, shape index: {}]   ;;  %s437_s3 = inlined_call_operand.vmem [shape: f32[1,128], index: 3, kind: input, shape index: {}]   ;;  %s438_s4 = inlined_call_operand.hbm [shape: f32[32,128], index: 4, kind: output, shape index: {}]  }
   0x1   :  { %v271_v0 = vld [vmem:[%s435_s1 + $0x8] sm:$0xff]  ;;  %279 = vset.pattern.permute.xlu1 %v325_v1  ;;  %278 = vset.pattern.permute.xlu0 %v325_v1  ;;  %v85_v2 = vld [vmem:[%s436_s2 + $0x10] sm:$0xff]  ;;  %v83_v3 = vld [vmem:[%s436_s2] sm:$0xff] }
   0x2   :  { %62 = vmatpush.bf16.msra.mxu0 %v271_v0  ;;  %272 = vmatpush.bf16.msra.mxu1 %v271_v0  ;;  %v270_v4 = vld [vmem:[%s435_s1] sm:$0xff] }
   0x3   :  { %99 = vperm.xlu1 %279, %v85_v2   ;;  %89 = vperm.xlu0 %278, %v83_v3  }
   0x4   :  { %9 = vsyncpa [#allocation3], 0  ;;  %v268_v5 = vld [vmem:[%s434_s0] sm:$0xff]  ;;  %v269_v6 = vld [vmem:[%s434_s0 + $0x8] sm:$0xff]  ;;  %vm49_vm0 = vcmask 261120   ;;  %s238_s7 = sshll.u32 %s438_s4, 4  ;;  %s239_s7 = int_to_ptr.hbm [resolvable:$true] %s238_s7 }
   0x5   :  { %v86_v7 = vld [vmem:[%s436_s2 + $0x18] sm:$0xff]  ;;  %v84_v8 = vld [vmem:[%s436_s2 + $0x8] sm:$0xff]  ;;  %v280_v15 = vld [vmem:[%s437_s3] ss:$0 sm:$0xff]  ;;  %s326_s2 = smov [#allocation2]   ;;  %s327_s8 = smov 128  }
   0x6   :  { %63 = vmatpush.bf16.msra.mxu0 %v270_v4  ;;  %273 = vmatpush.bf16.msra.mxu1 %v270_v4  ;;  %s236_s3 = sshll.u32 %s326_s2, 4  ;;  %s328_s9 = smov 8   ;;  %s237_s3 = int_to_ptr.vmem [resolvable:$true] %s236_s3 }
   0x9   :  { %266 = vmatmul.msk.bf16.vlgmr.msra.gmra.mxu0 %vm49_vm0, %v268_v5  ;;  %267 = vmatmul.msk.bf16.vlgmr.msra.gmra.mxu1 %vm49_vm0, %v269_v6 }
   0xb   :  { %104 = vperm.xlu1 %279, %v86_v7   ;;  %94 = vperm.xlu0 %278, %v84_v8  }
  0x75   :  { %v100_v13 = vpop.permute.xlu1 %99  ;;  %v90_v14 = vpop.permute.xlu0 %89 }
  0x7d   :  { %v95_v27 = vpop.permute.xlu0 %94  ;;  %v105_v29 = vpop.permute.xlu1 %104 }
  0x86   :  { %v65_v9 = vpop.f32.mrf.mxu0  ;;  %v70_v10 = vpop.f32.mrf.mxu1 }
  0x87   :  { %v75_v11 = vmul.f32 1.442695, %v65_v9  ;;  %v79_v12 = vmul.f32 1.442695, %v70_v10 }
  0x89   :  { %281 = vpow2.f32 %v75_v11 }
  0x8a   :  { %283 = vpow2.f32 %v79_v12 }
  0x8e   :  { %v67_v16 = vpop.f32.mrf.mxu0  ;;  %v72_v17 = vpop.f32.mrf.mxu1 }
  0x8f   :  { %v282_v18 = vpop.eup %281  ;;  %v77_v19 = vmul.f32 1.442695, %v67_v16  ;;  %v81_v20 = vmul.f32 1.442695, %v72_v17 }
  0x90   :  { %v284_v21 = vpop.eup %283  ;;  %v107_v22 = vmul.f32 %v282_v18, %v90_v14 }
  0x91   :  { %v109_v23 = vmul.f32 %v284_v21, %v100_v13  ;;  %285 = vpow2.f32 %v77_v19 }
  0x92   :  { %v381_v24 = vmul.f32 %v280_v15, %v107_v22  ;;  %287 = vpow2.f32 %v81_v20 }
  0x93   :  { %v383_v25 = vmul.f32 %v280_v15, %v109_v23 }
  0x94   :  { %119 = vadd.xlane.f32.xlu2 %v381_v24 }
  0x95   :  { %123 = vadd.xlane.f32.xlu0 %v383_v25 }
  0x97   :  { %v286_v26 = vpop.eup %285 }
  0x98   :  { %v288_v28 = vpop.eup %287  ;;  %v108_v30 = vmul.f32 %v286_v26, %v95_v27 }
  0x99   :  { %v110_v31 = vmul.f32 %v288_v28, %v105_v29 }
  0x9a   :  { %v387_v32 = vmul.f32 %v280_v15, %v108_v30 }
  0x9b   :  { %v389_v33 = vmul.f32 %v280_v15, %v110_v31 }
  0x9c   :  { %121 = vadd.xlane.f32.xlu2 %v387_v32  ;;  %v127_v34 = vadd.f32 %v387_v32, %v381_v24 }
  0x9d   :  { %125 = vadd.xlane.f32.xlu1 %v389_v33 }
  0x9e   :  { %v128_v35 = vadd.f32 %v127_v34, %v383_v25 }
  0xa0   :  { %v129_v36 = vadd.f32 %v128_v35, %v389_v33 }
  0xa2   :  { %v130_v37 = vrot.slane %v129_v36, 4 }
  0xa4   :  { %v131_v38 = vadd.f32 %v130_v37, %v129_v36 }
  0xa6   :  { %v132_v39 = vrot.slane %v131_v38, 2 }
  0xa8   :  { %v133_v40 = vadd.f32 %v132_v39, %v131_v38 }
  0xaa   :  { %v134_v41 = vrot.slane %v133_v40, 1 }
  0xac   :  { %v135_v42 = vadd.f32 %v134_v41, %v133_v40 }
  0xae   :  { %vm200_vm1 = vcmp.eq.f32.partialorder %v135_v42, 0.0 }
  0xaf   :  { %v201_v43 = vsel %vm200_vm1, 1.0, %v135_v42 }
  0xb0   :  { %289 = vrcp.f32 %v201_v43  ;;  %v213_v53 = vand.u32 2147483648, %v201_v43  ;;  %vm207_vm5 = vweird.f32 %v201_v43  ;;  %v211_v54 = vand.u32 2147483647, %v201_v43 }
  0xb2   :  { %v214_v63 = vor.u32 1.1754944e-38, %v213_v53  ;;  %vm212_vm9 = vcmp.eq.f32.partialorder %v211_v54, 8.507059e+37 }
  0xb6   :  { %v290_v44 = vpop.eup %289 }
  0xb7   :  { %v203_v45 = vmul.f32 %v290_v44, %v201_v43  ;;  %vm208_vm4 = vweird.f32 %v290_v44 }
  0xb8   :  { %vm397_vm6 = vmor %vm207_vm5, %vm208_vm4 }
  0xb9   :  { %v204_v46 = vsub.f32 1.0, %v203_v45 }
  0xbb   :  { %v205_v49 = vmul.f32 %v290_v44, %v204_v46 }
  0xbd   :  { %v206_v52 = vadd.f32 %v290_v44, %v205_v49 }
  0xbf   :  { %v210_v60 = vsel %vm397_vm6, %v290_v44, %v206_v52 }
  0xc0   :  { %v409_v3 = vsel %vm212_vm9, %v214_v63, %v210_v60 }
  0xc1   :  { %v222_v14 = vmul.f32 %v409_v3, %v383_v25  ;;  %v220_v27 = vmul.f32 %v409_v3, %v381_v24  ;;  %v221_v46 = vmul.f32 %v409_v3, %v387_v32 }
 0x107   :  { %v120_v47 = vpop.xlane.xlu2 %119 }
 0x108   :  { %v124_v48 = vpop.xlane.xlu0 %123  ;;  %vm136_vm2 = vcmp.eq.f32.partialorder %v120_v47, 0.0 }
 0x109   :  { %vm138_vm3 = vcmp.eq.f32.partialorder %v124_v48, 0.0  ;;  %v140_v50 = vsel %vm136_vm2, 1.0, %v120_v47 }
 0x10a   :  { %v142_v51 = vsel %vm138_vm3, 1.0, %v124_v48  ;;  %291 = vrcp.f32 %v140_v50  ;;  %v155_v5 = vand.u32 2147483648, %v140_v50  ;;  %v153_v8 = vand.u32 2147483647, %v140_v50 }
 0x10b   :  { %293 = vrcp.f32 %v142_v51  ;;  %v183_v6 = vand.u32 2147483648, %v142_v51  ;;  %v181_v10 = vand.u32 2147483647, %v142_v51  ;;  %vm149_vm12 = vweird.f32 %v140_v50 }
 0x10c   :  { %vm177_vm13 = vweird.f32 %v142_v51  ;;  %v156_v15 = vor.u32 1.1754944e-38, %v155_v5  ;;  %vm154_vm0 = vcmp.eq.f32.partialorder %v153_v8, 8.507059e+37 }
 0x10d   :  { %v184_v17 = vor.u32 1.1754944e-38, %v183_v6  ;;  %vm182_vm1 = vcmp.eq.f32.partialorder %v181_v10, 8.507059e+37 }
 0x10f   :  { %v122_v55 = vpop.xlane.xlu2 %121 }
 0x110   :  { %v292_v56 = vpop.eup %291  ;;  %v126_v58 = vpop.xlane.xlu1 %125  ;;  %vm137_vm7 = vcmp.eq.f32.partialorder %v122_v55, 0.0 }
 0x111   :  { %v294_v59 = vpop.eup %293  ;;  %v145_v61 = vmul.f32 %v292_v56, %v140_v50  ;;  %vm139_vm8 = vcmp.eq.f32.partialorder %v126_v58, 0.0  ;;  %v403_v62 = vsel %vm137_vm7, 1.0, %v122_v55  ;;  %vm150_vm10 = vweird.f32 %v292_v56 }
 0x112   :  { %v173_v0 = vmul.f32 %v294_v59, %v142_v51  ;;  %v405_v1 = vsel %vm139_vm8, 1.0, %v126_v58  ;;  %295 = vrcp.f32 %v403_v62  ;;  %vm178_vm11 = vweird.f32 %v294_v59  ;;  %vm151_vm14 = vmor %vm149_vm12, %vm150_vm10 }
 0x113   :  { %v146_v2 = vsub.f32 1.0, %v145_v61  ;;  %297 = vrcp.f32 %v405_v1  ;;  %vm179_vm15 = vmor %vm177_vm13, %vm178_vm11  ;;  %v197_v31 = vand.u32 2147483648, %v405_v1  ;;  %v169_v34 = vand.u32 2147483648, %v403_v62 }
 0x114   :  { %v174_v4 = vsub.f32 1.0, %v173_v0  ;;  %v167_v37 = vand.u32 2147483647, %v403_v62  ;;  %v195_v40 = vand.u32 2147483647, %v405_v1  ;;  %vm163_vm4 = vweird.f32 %v403_v62 }
 0x115   :  { %v147_v7 = vmul.f32 %v292_v56, %v146_v2  ;;  %vm191_vm5 = vweird.f32 %v405_v1  ;;  %v170_v41 = vor.u32 1.1754944e-38, %v169_v34  ;;  %v198_v42 = vor.u32 1.1754944e-38, %v197_v31 }
 0x116   :  { %v175_v9 = vmul.f32 %v294_v59, %v174_v4  ;;  %vm168_vm8 = vcmp.eq.f32.partialorder %v167_v37, 8.507059e+37  ;;  %vm196_vm9 = vcmp.eq.f32.partialorder %v195_v40, 8.507059e+37  ;;  %v223_v50 = vmul.f32 %v409_v3, %v389_v33 }
 0x117   :  { %v148_v11 = vadd.f32 %v292_v56, %v147_v7 }
 0x118   :  { %v296_v12 = vpop.eup %295  ;;  %v176_v13 = vadd.f32 %v294_v59, %v175_v9 }
 0x119   :  { %v298_v16 = vpop.eup %297  ;;  %v152_v18 = vsel %vm151_vm14, %v292_v56, %v148_v11  ;;  %v159_v19 = vmul.f32 %v296_v12, %v403_v62  ;;  %vm164_vm2 = vweird.f32 %v296_v12 }
 0x11a   :  { %v180_v20 = vsel %vm179_vm15, %v294_v59, %v176_v13  ;;  %v157_v21 = vsel %vm154_vm0, %v156_v15, %v152_v18  ;;  %v187_v22 = vmul.f32 %v298_v16, %v405_v1  ;;  %vm192_vm3 = vweird.f32 %v298_v16  ;;  %vm165_vm6 = vmor %vm163_vm4, %vm164_vm2 }
 0x11b   :  { %v185_v23 = vsel %vm182_vm1, %v184_v17, %v180_v20  ;;  %v216_v26 = vmul.f32 %v157_v21, %v381_v24  ;;  %v160_v28 = vsub.f32 1.0, %v159_v19  ;;  %vm193_vm7 = vmor %vm191_vm5, %vm192_vm3 }
 0x11c   :  { %v218_v29 = vmul.f32 %v185_v23, %v383_v25  ;;  %v188_v30 = vsub.f32 1.0, %v187_v22 }
 0x11d   :  { %v224_v35 = vmul.f32 %v220_v27, %v216_v26  ;;  %v161_v36 = vmul.f32 %v296_v12, %v160_v28 }
 0x11e   :  { %v226_v38 = vmul.f32 %v222_v14, %v218_v29  ;;  %v189_v39 = vmul.f32 %v298_v16, %v188_v30 }
 0x11f   :  { %228 = vst [vmem:[#allocation2] sm:$0xff] %v224_v35  ;;  %v162_v24 = vadd.f32 %v296_v12, %v161_v36 }
 0x120   :  { %230 = vst [vmem:[#allocation2 + $0x10] sm:$0xff] %v226_v38  ;;  %v190_v25 = vadd.f32 %v298_v16, %v189_v39 }
 0x121   :  { %v166_v43 = vsel %vm165_vm6, %v296_v12, %v162_v24 }
 0x122   :  { %v194_v44 = vsel %vm193_vm7, %v298_v16, %v190_v25  ;;  %v171_v45 = vsel %vm168_vm8, %v170_v41, %v166_v43 }
 0x123   :  { %v199_v47 = vsel %vm196_vm9, %v198_v42, %v194_v44  ;;  %v217_v48 = vmul.f32 %v171_v45, %v387_v32 }
 0x124   :  { %v219_v49 = vmul.f32 %v199_v47, %v389_v33 }
 0x125   :  { %v225_v51 = vmul.f32 %v221_v46, %v217_v48 }
 0x126   :  { %v227_v52 = vmul.f32 %v223_v50, %v219_v49 }
 0x127   :  { %229 = vst [vmem:[#allocation2 + $0x8] sm:$0xff] %v225_v51 }
 0x128   :  { %231 = vst [vmem:[#allocation2 + $0x18] sm:$0xff] %v227_v52 }
 0x129   :  { %244 = dma.vmem_to_hbm [thread:$0]  %s237_s3, 512, %s239_s7, [#allocation3], %s327_s8, %s327_s8, %s328_s9  }
 0x12a   :  { %323 = dma.done.wait [#allocation3], 512  }
 0x12b   :  { %324 = vsyncadd [#allocation3], 4294966784 }
 0x12c   :  { %249 = vsyncpa [#allocation3], 1 }

</bundles_post_ra>
